<compile_context>
chip_gen: v6e
topology: v6e:2x2x1
jax: 0.10.0
libtpu: 0.0.40
codegen_flags: <defaults>
</compile_context>

<pallas_src>
import jax
import jax.numpy as jnp
from jax.experimental import pallas as pl
from jax.experimental.pallas import tpu as pltpu


def _round_up(x, m):
    return ((x + m - 1) // m) * m


# ----------------------------- Pallas kernel --------------------------------
def _make_kernel(n_cat, cat_offsets, num_pad, cat_pad, wpad, tb):
    """Fused (embed-folded) MLP + sigmoid kernel for one batch tile of tb rows."""
    w2_row0 = num_pad + cat_pad

    def kernel(x_num_ref, x_cat_ref, w_ref, bias_ref, o_ref):
        # ---- Linear-1, numerical segment (bf16 MXU operands, f32 accum) ----
        x_num = x_num_ref[...].astype(jnp.bfloat16)                # (tb, num_pad)
        h = jnp.dot(x_num, w_ref[0:num_pad, :],
                    preferred_element_type=jnp.float32)            # (tb, wpad)

        # ---- Linear-1, categorical segment ---------------------------------
        # emb_table @ W1_block was folded at init into w_ref rows
        # [num_pad : num_pad+cat_pad); here we only build ONE combined one-hot
        # over all categorical features (disjoint segments -> masks just sum).
        if n_cat > 0:
            x_cat = x_cat_ref[...]                                  # (tb, n_cat) i32
            iota = jax.lax.broadcasted_iota(jnp.int32, (tb, cat_pad), 1)
            oh = (iota == (x_cat[:, 0:1] + cat_offsets[0])).astype(jnp.float32)
            for i in range(1, n_cat):
                oh = oh + (iota == (x_cat[:, i:i + 1] + cat_offsets[i])
                           ).astype(jnp.float32)
            # TODO(synk): out-of-range categorical indices silently yield a
            # zero embedding here (PyTorch nn.Embedding would raise).
            h = h + jnp.dot(oh.astype(jnp.bfloat16),
                            w_ref[num_pad:w2_row0, :],
                            preferred_element_type=jnp.float32)

        # ---- bias + ReLU + Linear-2 + exact sigmoid -------------------------
        bias = bias_ref[...]                                        # (2, wpad) f32
        h = jnp.maximum(h + bias[0:1, :], 0.0)
        logits = jnp.dot(h.astype(jnp.bfloat16),
                         w_ref[w2_row0:w2_row0 + wpad, :],
                         preferred_element_type=jnp.float32) + bias[1:2, :]
        # Exact sigmoid: keeps outputs strictly in [0, 1] (approx reciprocal
        # can overshoot 1.0); exp runs on the EUP, one divide is negligible.
        o_ref[...] = 1.0 / (1.0 + jnp.exp(-logits))

    return kernel


def maskgen_forward(x_num, x_cat, w_slab, bias_slab, *, n_cat, cat_offsets,
                    num_pad, cat_pad, wpad, batch_tile=256):
    """Fused forward: folded embeddings + Linear + ReLU + Linear + sigmoid."""
    B = x_num.shape[0]

    # Batch tiling: one grid step at small B, "parallel" tiles at large B so
    # both v7x TensorCores get work and per-step VMEM stays bounded.
    b_pad = _round_up(B, 8)
    tb = b_pad if b_pad <= batch_tile else batch_tile
    b_pad = _round_up(b_pad, tb)

    x_num_p = jnp.pad(x_num, ((0, b_pad - B), (0, num_pad - x_num.shape[1])))
    x_cat_p = jnp.pad(x_cat, ((0, b_pad - B), (0, 0)))

    kernel = _make_kernel(n_cat, cat_offsets, num_pad, cat_pad, wpad, tb)

    flops = 2 * b_pad * (num_pad + cat_pad + wpad) * wpad
    bytes_accessed = (x_num_p.size * 4 + x_cat_p.size * 4 + w_slab.size * 2
                      + bias_slab.size * 4 + b_pad * wpad * 4)

    out = pl.pallas_call(
        kernel,
        out_shape=jax.ShapeDtypeStruct((b_pad, wpad), jnp.float32),
        grid_spec=pltpu.PrefetchScalarGridSpec(
            num_scalar_prefetch=0,
            grid=(b_pad // tb,),
            in_specs=[
                pl.BlockSpec((tb, num_pad), lambda b: (b, 0)),
                pl.BlockSpec((tb, x_cat_p.shape[1]), lambda b: (b, 0)),
                # Weight / bias slabs: same block every step -> stay resident.
                pl.BlockSpec(w_slab.shape, lambda b: (0, 0)),
                pl.BlockSpec(bias_slab.shape, lambda b: (0, 0)),
            ],
            out_specs=pl.BlockSpec((tb, wpad), lambda b: (b, 0)),
        ),
        compiler_params=pltpu.CompilerParams(
            dimension_semantics=("parallel",)),
        cost_estimate=pl.CostEstimate(
            flops=flops,
            transcendentals=b_pad * wpad,
            bytes_accessed=bytes_accessed),
    )(x_num_p, x_cat_p, w_slab, bias_slab)
    return out[:B]


# ----------------------------- MaskGenerator --------------------------------
class MaskGeneratorPallas:
    """JAX/Pallas reimplementation of MaskGenerator.forward."""

    HIDDEN = 64

    def __init__(self, cat_cardinalities, embedding_dims, num_numerical_features,
                 mask_sizes, key):
        self.cat_cardinalities = list(cat_cardinalities)
        self.embedding_dims = list(embedding_dims)
        self.num_numerical_features = num_numerical_features
        self.mask_sizes = list(mask_sizes)

        input_dim = sum(embedding_dims) + num_numerical_features
        hidden = self.HIDDEN
        out_dim = sum(mask_sizes)
        # Common lane width: hidden (64) and out_dim (24) both padded to 128 so
        # every vreg is full-lane and the output store is lane-dense.
        wpad = max(_round_up(hidden, 128), _round_up(out_dim, 128))

        keys = jax.random.split(key, len(cat_cardinalities) + 4)
        # Embedding tables (~N(0,1), like nn.Embedding).
        self.emb_tables = [
            jax.random.normal(keys[i], (card, dim), dtype=jnp.float32)
            for i, (card, dim) in enumerate(zip(cat_cardinalities, embedding_dims))
        ]
        k1, k2, k3, k4 = keys[-4:]
        s1 = 1.0 / float(input_dim) ** 0.5
        s2 = 1.0 / float(hidden) ** 0.5
        # Reference (unpadded) controller params, stored (in, out).
        self.w1 = jax.random.uniform(k1, (input_dim, hidden), jnp.float32, -s1, s1)
        self.b1 = jax.random.uniform(k2, (1, hidden), jnp.float32, -s1, s1)
        self.w2 = jax.random.uniform(k3, (hidden, out_dim), jnp.float32, -s2, s2)
        self.b2 = jax.random.uniform(k4, (1, out_dim), jnp.float32, -s2, s2)

        # ---- Kernel params: fold embeddings into W1, pack into 2 slabs -----
        nn_ = num_numerical_features
        cards = [int(t.shape[0]) for t in self.emb_tables]
        cat_total = sum(cards)
        # bf16 sublane tile is 16 rows -> pad each slab segment to x16 so the
        # in-kernel ref slices are aligned (no layout copies).
        num_pad = _round_up(max(nn_, 1), 16)
        cat_pad = _round_up(max(cat_total, 1), 16)

        w1n = jnp.pad(self.w1[:nn_], ((0, num_pad - nn_), (0, wpad - hidden)))
        folded = []
        off = nn_
        for tbl, d in zip(self.emb_tables, embedding_dims):
            folded.append(tbl @ self.w1[off:off + d])        # (card, hidden) f32
            off += d
        if folded:
            w1c = jnp.concatenate(folded, axis=0)
        else:
            w1c = jnp.zeros((0, hidden), jnp.float32)
        w1c = jnp.pad(w1c, ((0, cat_pad - cat_total), (0, wpad - hidden)))
        w2p = jnp.pad(self.w2, ((0, wpad - hidden), (0, wpad - out_dim)))
        # One contiguous bf16 weight slab: [W1_num ; folded W1_cat ; W2].
        self.w_slab = jnp.concatenate([w1n, w1c, w2p], axis=0).astype(jnp.bfloat16)

        b1p = jnp.pad(self.b1, ((0, 0), (0, wpad - hidden)))
        b2p = jnp.pad(self.b2, ((0, 0), (0, wpad - out_dim)))
        self.bias_slab = jnp.concatenate([b1p, b2p], axis=0)   # (2, wpad) f32

        offsets, acc = [], 0
        for c in cards:
            offsets.append(acc)
            acc += c
        self.cat_offsets = tuple(offsets)
        self.num_pad, self.cat_pad, self.wpad = num_pad, cat_pad, wpad
        self.out_dim = out_dim

    def _embed_input(self, x_num, x_cat):
        # Plain-JAX reference path (only used for the correctness cross-check).
        embedded = [jnp.take(tbl, x_cat[:, i], axis=0)
                    for i, tbl in enumerate(self.emb_tables)]
        return jnp.concatenate([x_num] + embedded, axis=1)

    def forward(self, x_num, x_cat):
        out = maskgen_forward(
            x_num, x_cat.astype(jnp.int32), self.w_slab, self.bias_slab,
            n_cat=len(self.cat_cardinalities), cat_offsets=self.cat_offsets,
            num_pad=self.num_pad, cat_pad=self.cat_pad, wpad=self.wpad)
        mask = out[:, :self.out_dim]   # drop zero-padded lanes
        # torch.split(mask, self.mask_sizes, dim=1) -> wrapper-side slices
        masks, off = [], 0
        for sz in self.mask_sizes:
            masks.append(mask[:, off:off + sz])
            off += sz
        return tuple(masks)


# --------------------------------- main --------------------------------------
if __name__ == "__main__":
    key = jax.random.PRNGKey(0)
    k_model, k_num, k_cat = jax.random.split(key, 3)

    cat_cardinalities = [10, 7, 5]
    embedding_dims = [4, 3, 5]          # sum = 12
    num_numerical_features = 4          # input_dim = 16
    mask_sizes = [8, 16]                # out_dim = 24
    B = 8

    gen = MaskGeneratorPallas(cat_cardinalities, embedding_dims,
                              num_numerical_features, mask_sizes, k_model)

    x_num = jax.random.normal(k_num, (B, num_numerical_features), dtype=jnp.float32)
    x_cat = jnp.stack(
        [
            jax.random.randint(jax.random.fold_in(k_cat, i), (B,), 0, card)
            for i, card in enumerate(cat_cardinalities)
        ],
        axis=1,
    ).astype(jnp.int32)

    masks = gen.forward(x_num, x_cat)
    masks = jax.block_until_ready(masks)

    # sanity: shapes and sigmoid range (exact sigmoid -> never exceeds 1.0)
    assert len(masks) == len(mask_sizes)
    for m, sz in zip(masks, mask_sizes):
        assert m.shape == (B, sz)
        assert bool(jnp.all(m >= 0.0)) and bool(jnp.all(m <= 1.0))
    out_got = jnp.concatenate(masks, axis=1)

    # --- tight check: pure-JAX reference mirroring the kernel's exact math ---
    # (same bf16 slab operands, f32 accumulation, folded embeddings, one-hot)
    x_num_p = jnp.pad(x_num, ((0, 0), (0, gen.num_pad - num_numerical_features)))
    oh = jnp.zeros((B, gen.cat_pad), jnp.float32)
    for i, off in enumerate(gen.cat_offsets):
        oh = oh.at[jnp.arange(B), x_cat[:, i] + off].set(1.0)
    w = gen.w_slab
    r0, r1 = gen.num_pad, gen.num_pad + gen.cat_pad
    h_ref = (jnp.dot(x_num_p.astype(jnp.bfloat16), w[:r0],
                     preferred_element_type=jnp.float32)
             + jnp.dot(oh.astype(jnp.bfloat16), w[r0:r1],
                       preferred_element_type=jnp.float32))
    h_ref = jnp.maximum(h_ref + gen.bias_slab[0:1], 0.0)
    logits_ref = jnp.dot(h_ref.astype(jnp.bfloat16), w[r1:r1 + gen.wpad],
                         preferred_element_type=jnp.float32) + gen.bias_slab[1:2]
    out_mirror = jax.nn.sigmoid(logits_ref)[:, :gen.out_dim]
    err_mirror = float(jnp.max(jnp.abs(out_got - out_mirror)))
    assert bool(jnp.allclose(out_got, out_mirror, atol=3e-3, rtol=0.0)), err_mirror

    # --- loose check: true f32 PyTorch-semantics reference (bf16 rounding) ---
    x_full = gen._embed_input(x_num, x_cat)
    h32 = jnp.maximum(x_full @ gen.w1 + gen.b1, 0.0)
    out_f32 = jax.nn.sigmoid(h32 @ gen.w2 + gen.b2)
    err_f32 = float(jnp.max(jnp.abs(out_got - out_f32)))
    assert bool(jnp.allclose(out_got, out_f32, atol=5e-2, rtol=0.0)), err_f32

    print("KERNEL_OK")
</pallas_src>

<mosaic_0001>
module attributes {stable_mosaic.version = 11 : i64} {
  func.func @kernel(%arg0: i32, %arg1: memref<8x16xf32, #tpu.memory_space<vmem>>, %arg2: memref<8x3xi32, #tpu.memory_space<vmem>>, %arg3: memref<176x128xbf16, #tpu.memory_space<vmem>>, %arg4: memref<2x128xf32, #tpu.memory_space<vmem>>, %arg5: memref<8x128xf32, #tpu.memory_space<vmem>>) attributes {dimension_semantics = [#tpu.dimension_semantics<parallel>], iteration_bounds = array<i64: 1>, scalar_prefetch = 0 : i64, scratch_operands = 0 : i64, tpu.core_type = #tpu.core_type<tc>, window_params = [{transform_indices = @transform_0, window_bounds = array<i64: 8, 16>}, {transform_indices = @transform_1, window_bounds = array<i64: 8, 3>}, {pipeline_mode = #tpu.pipeline_mode<synchronous>, transform_indices = @transform_2, window_bounds = array<i64: 176, 128>}, {pipeline_mode = #tpu.pipeline_mode<synchronous>, transform_indices = @transform_3, window_bounds = array<i64: 2, 128>}, {transform_indices = @transform_4, window_bounds = array<i64: 8, 128>}]} {
    %c0 = arith.constant 0 : index
    %c0_0 = arith.constant 0 : index
    %0 = vector.load %arg1[%c0, %c0_0] : memref<8x16xf32, #tpu.memory_space<vmem>>, vector<8x16xf32>
    %1 = arith.truncf %0 : vector<8x16xf32> to vector<8x16xbf16>
    %c0_1 = arith.constant 0 : index
    %c0_2 = arith.constant 0 : index
    %2 = vector.load %arg3[%c0_1, %c0_2] : memref<176x128xbf16, #tpu.memory_space<vmem>>, vector<16x128xbf16>
    %cst = arith.constant dense<0.000000e+00> : vector<8x128xf32>
    %3 = tpu.matmul %1, %2, %cst {dimension_numbers = #tpu.dot_dimension_numbers<[1], [0], [0], [1], [0, 0, 1, 1], [], []>} : vector<8x16xbf16>, vector<16x128xbf16>, vector<8x128xf32> -> vector<8x128xf32>
    %c0_3 = arith.constant 0 : index
    %c0_4 = arith.constant 0 : index
    %4 = vector.load %arg2[%c0_3, %c0_4] : memref<8x3xi32, #tpu.memory_space<vmem>>, vector<8x3xi32>
    %5 = tpu.iota {dimensions = array<i32: 1>} : vector<8x32xi32>
    %6 = vector.extract_strided_slice %4 {offsets = [0, 0], sizes = [8, 1], strides = [1, 1]} : vector<8x3xi32> to vector<8x1xi32>
    %c0_i32 = arith.constant 0 : i32
    %7 = vector.broadcast %c0_i32 : i32 to vector<8x1xi32>
    %8 = arith.addi %6, %7 : vector<8x1xi32>
    %9 = vector.broadcast %8 : vector<8x1xi32> to vector<8x32xi32>
    %10 = arith.cmpi eq, %5, %9 : vector<8x32xi32>
    %11 = arith.extui %10 : vector<8x32xi1> to vector<8x32xi32>
    %12 = arith.sitofp %11 : vector<8x32xi32> to vector<8x32xf32>
    %13 = vector.extract_strided_slice %4 {offsets = [0, 1], sizes = [8, 1], strides = [1, 1]} : vector<8x3xi32> to vector<8x1xi32>
    %c10_i32 = arith.constant 10 : i32
    %14 = vector.broadcast %c10_i32 : i32 to vector<8x1xi32>
    %15 = arith.addi %13, %14 : vector<8x1xi32>
    %16 = vector.broadcast %15 : vector<8x1xi32> to vector<8x32xi32>
    %17 = arith.cmpi eq, %5, %16 : vector<8x32xi32>
    %18 = arith.extui %17 : vector<8x32xi1> to vector<8x32xi32>
    %19 = arith.sitofp %18 : vector<8x32xi32> to vector<8x32xf32>
    %20 = arith.addf %12, %19 : vector<8x32xf32>
    %21 = vector.extract_strided_slice %4 {offsets = [0, 2], sizes = [8, 1], strides = [1, 1]} : vector<8x3xi32> to vector<8x1xi32>
    %c17_i32 = arith.constant 17 : i32
    %22 = vector.broadcast %c17_i32 : i32 to vector<8x1xi32>
    %23 = arith.addi %21, %22 : vector<8x1xi32>
    %24 = vector.broadcast %23 : vector<8x1xi32> to vector<8x32xi32>
    %25 = arith.cmpi eq, %5, %24 : vector<8x32xi32>
    %26 = arith.extui %25 : vector<8x32xi1> to vector<8x32xi32>
    %27 = arith.sitofp %26 : vector<8x32xi32> to vector<8x32xf32>
    %28 = arith.addf %20, %27 : vector<8x32xf32>
    %29 = arith.truncf %28 : vector<8x32xf32> to vector<8x32xbf16>
    %c16 = arith.constant 16 : index
    %c0_5 = arith.constant 0 : index
    %30 = vector.load %arg3[%c16, %c0_5] : memref<176x128xbf16, #tpu.memory_space<vmem>>, vector<32x128xbf16>
    %cst_6 = arith.constant dense<0.000000e+00> : vector<8x128xf32>
    %31 = tpu.matmul %29, %30, %cst_6 {dimension_numbers = #tpu.dot_dimension_numbers<[1], [0], [0], [1], [0, 0, 1, 1], [], []>} : vector<8x32xbf16>, vector<32x128xbf16>, vector<8x128xf32> -> vector<8x128xf32>
    %32 = arith.addf %3, %31 : vector<8x128xf32>
    %c0_7 = arith.constant 0 : index
    %c0_8 = arith.constant 0 : index
    %33 = vector.load %arg4[%c0_7, %c0_8] : memref<2x128xf32, #tpu.memory_space<vmem>>, vector<2x128xf32>
    %34 = vector.extract_strided_slice %33 {offsets = [0, 0], sizes = [1, 128], strides = [1, 1]} : vector<2x128xf32> to vector<1x128xf32>
    %35 = vector.broadcast %34 : vector<1x128xf32> to vector<8x128xf32>
    %36 = arith.addf %32, %35 : vector<8x128xf32>
    %cst_9 = arith.constant 0.000000e+00 : f32
    %37 = vector.broadcast %cst_9 : f32 to vector<8x128xf32>
    %38 = arith.maximumf %36, %37 : vector<8x128xf32>
    %39 = arith.truncf %38 : vector<8x128xf32> to vector<8x128xbf16>
    %c48 = arith.constant 48 : index
    %c0_10 = arith.constant 0 : index
    %40 = vector.load %arg3[%c48, %c0_10] : memref<176x128xbf16, #tpu.memory_space<vmem>>, vector<128x128xbf16>
    %cst_11 = arith.constant dense<0.000000e+00> : vector<8x128xf32>
    %41 = tpu.matmul %39, %40, %cst_11 {dimension_numbers = #tpu.dot_dimension_numbers<[1], [0], [0], [1], [0, 0, 1, 1], [], []>} : vector<8x128xbf16>, vector<128x128xbf16>, vector<8x128xf32> -> vector<8x128xf32>
    %42 = vector.extract_strided_slice %33 {offsets = [1, 0], sizes = [1, 128], strides = [1, 1]} : vector<2x128xf32> to vector<1x128xf32>
    %43 = vector.broadcast %42 : vector<1x128xf32> to vector<8x128xf32>
    %44 = arith.addf %41, %43 : vector<8x128xf32>
    %cst_12 = arith.constant 0.000000e+00 : f32
    %45 = vector.broadcast %cst_12 : f32 to vector<8x128xf32>
    %46 = arith.subf %45, %44 : vector<8x128xf32>
    %47 = math.exp %46 : vector<8x128xf32>
    %cst_13 = arith.constant 1.000000e+00 : f32
    %48 = vector.broadcast %cst_13 : f32 to vector<8x128xf32>
    %49 = arith.addf %48, %47 : vector<8x128xf32>
    %cst_14 = arith.constant 1.000000e+00 : f32
    %50 = vector.broadcast %cst_14 : f32 to vector<8x128xf32>
    %51 = arith.divf %50, %49 : vector<8x128xf32>
    %c0_15 = arith.constant 0 : index
    %c0_16 = arith.constant 0 : index
    %52 = vector.load %arg5[%c0_15, %c0_16] : memref<8x128xf32, #tpu.memory_space<vmem>>, vector<8x128xf32>
    tpu.vector_store %arg5[%c0_15, %c0_16], %51 {strides = array<i32>} : memref<8x128xf32, #tpu.memory_space<vmem>>, vector<8x128xf32>,
    return
  }
  func.func @transform_0(%arg0: i32) -> (i32, i32) {
    %c0_i32 = arith.constant 0 : i32
    %c0_i32_0 = arith.constant 0 : i32
    return %arg0, %c0_i32 : i32, i32
  }
  func.func @transform_1(%arg0: i32) -> (i32, i32) {
    %c0_i32 = arith.constant 0 : i32
    %c0_i32_0 = arith.constant 0 : i32
    return %arg0, %c0_i32 : i32, i32
  }
  func.func @transform_2(%arg0: i32) -> (i32, i32) {
    %c0_i32 = arith.constant 0 : i32
    %c0_i32_0 = arith.constant 0 : i32
    %c0_i32_1 = arith.constant 0 : i32
    return %c0_i32, %c0_i32_0 : i32, i32
  }
  func.func @transform_3(%arg0: i32) -> (i32, i32) {
    %c0_i32 = arith.constant 0 : i32
    %c0_i32_0 = arith.constant 0 : i32
    %c0_i32_1 = arith.constant 0 : i32
    return %c0_i32, %c0_i32_0 : i32, i32
  }
  func.func @transform_4(%arg0: i32) -> (i32, i32) {
    %c0_i32 = arith.constant 0 : i32
    %c0_i32_0 = arith.constant 0 : i32
    return %arg0, %c0_i32 : i32, i32
  }
}

</mosaic_0001>

<bundles_post_ra>
// kernel: tpu_custom_call.1
= control target key start
LH: loop header
LB: loop body
LE: loop exit
PB: predicated region body
PF: predicated region fallthrough
CT: control target
= control target key end

     0   :  { %9 = vsyncpa [#allocation3], 0  ;;  %s516_s0 = inlined_call_operand.vmem [shape: f32[8,16], index: 0, kind: input, shape index: {}]   ;;  %s517_s1 = inlined_call_operand.vmem [shape: s32[8,3], index: 1, kind: input, shape index: {}]   ;;  %s518_s2 = inlined_call_operand.hbm [shape: bf16[176,128], index: 2, kind: input, shape index: {}]   ;;  %s519_s3 = inlined_call_operand.vmem [shape: f32[2,128], index: 3, kind: input, shape index: {}]   ;;  %s520_s4 = inlined_call_operand.hbm [shape: f32[8,128], index: 4, kind: output, shape index: {}]  }
   0x1   :  { %10 = vsyncpa [#allocation4], 0  ;;  %s447_s15 = smov [#allocation2]  }
   0x2   :  { %s20_s16 = sshll.u32 %s447_s15, 4  ;;  %s21_s16 = int_to_ptr.vmem [resolvable:$true] %s20_s16 }
   0x3   :  { %s411_s17 = scalar_lea.vmem %s21_s16, 1408  ;;  %p416_p1 = scmp.lt.s32.totalorder %s21_s16, %s21_s16 }
   0x4   :  { %p412_p0 = scmp.ne.s32.totalorder %s21_s16, %s411_s17  ;;  %p417_p2 = scmp.lt.s32.totalorder %s411_s17, %s411_s17 }
   0x6   :  { %p418_p3 = por %p417_p2, %p416_p1 }
   0x8   :  { %p419_p4 = pnand %p418_p3, %p412_p0 }
   0xa   :  { %422 = shalt.err (!%p419_p4)
}
   0xb   :  { %s448_s18 = smov 64   ;;  %s449_s19 = smov 4  }
   0xc   :  { %26 = dma.hbm_to_vmem [thread:$0]  %s518_s2, 1408, %s21_s16, [#allocation3], %s448_s18, %s448_s18, %s449_s19  }
   0xd   :  { %443 = dma.done.wait [#allocation3], 1408  }
   0xe   :  { %444 = vsyncadd [#allocation3], 4294965888  ;;  %v450_v0 = vmov 0   ;;  %v451_v1 = vmov 2   ;;  %v452_v2 = vmov 0.0   ;;  %v37_v3 = vld [vmem:[%s517_s1] sm:$0xff]  ;;  %v38_v13 = vlaneseq }
   0xf   :  { %384 = vset.pattern.permute.xlu0 %v450_v0  ;;  %386 = vset.pattern.permute.xlu1 %v451_v1  ;;  %v46_v4 = vadd.s32 10, %v37_v3  ;;  %v54_v5 = vadd.s32 17, %v37_v3  ;;  %v388_v6 = vld [vmem:[#allocation2 + $0x10] sm:$0xff]   ;;  %v453_v7 = vmov 1   ;;  %v389_v8 = vld [vmem:[#allocation2 + $0x8] sm:$0xff]   ;;  %vm454_vm0 = vmmov 0  }
  0x10   :  { %341 = vmatprep.subr.bf16.mxu0 %v452_v2  ;;  %355 = vmatprep.subr.bf16.mxu1 %v452_v2  ;;  %v391_v9 = vld [vmem:[#allocation2 + $0x50] sm:$0xff]   ;;  %v392_v10 = vld [vmem:[#allocation2 + $0x48] sm:$0xff]   ;;  %v393_v11 = vld [vmem:[#allocation2 + $0x40] sm:$0xff]   ;;  %v39_v14 = vand.u32 127, %v38_v13  ;;  %vm79_vm4 = vcmask 261120   ;;  %vm129_vm5 = vcmask 130048  }
  0x11   :  { %41 = vperm.xlu0 %384, %v37_v3   ;;  %56 = vperm.xlu1 %386, %v54_v5   ;;  %v394_v12 = vld [vmem:[#allocation2 + $0x38] sm:$0xff]   ;;  %v390_v23 = vld [vmem:[#allocation2] sm:$0xff]   ;;  %v395_v27 = vld [vmem:[#allocation2 + $0x30] sm:$0xff]   ;;  %v175_v31 = vshrl.u32 %v38_v13, 7 }
  0x12   :  { %342 = vmatpush3.bf16.msra.mxu0 %v388_v6  ;;  %345 = vmatprep.mubr.msk.bf16.mxu0 %vm454_vm0, %v452_v2  ;;  %v33_v25 = vld [vmem:[%s516_s0] sm:$0xff]  ;;  %v396_v28 = vld [vmem:[#allocation2 + $0x28] sm:$0xff]   ;;  %v398_v30 = vld [vmem:[#allocation2 + $0x18] sm:$0xff]  }
  0x13   :  { %343 = vmatprep.subr.bf16.mxu0 %v452_v2  ;;  %371 = vmatprep.mubr.msk.bf16.mxu1 %vm454_vm0, %v452_v2  ;;  %v34_v26 = vpack.c.bf16 %v33_v25, %v33_v25  ;;  %v397_v29 = vld [vmem:[#allocation2 + $0x20] sm:$0xff]   ;;  %v199_v32 = vsub.s32 1, %v175_v31  ;;  %v176_v37 = vsub.s32 0, %v175_v31 }
  0x14   :  { %356 = vmatpush3.bf16.msra.mxu1 %v391_v9  ;;  %v173_v33 = vld [vmem:[%s519_s3] sm:$0x3]  ;;  %s455_s3 = smov [#allocation5]  }
  0x15   :  { %385 = vset.pattern.permute.xlu0 %v453_v7  ;;  %357 = vmatprep.subr.bf16.mxu1 %v452_v2  ;;  %v200_v34 = vrot.slane %v173_v33, %v199_v32  ;;  %v177_v40 = vrot.slane %v173_v33, %v176_v37  ;;  %s302_s25 = sshll.u32 %s455_s3, 4  ;;  %s303_s25 = int_to_ptr.vmem [resolvable:$true] %s302_s25 }
  0x16   :  { %48 = vperm.xlu0 %385, %v46_v4   ;;  %344 = vmatpush3.bf16.msra.mxu0 %v389_v8  ;;  %s423_s26 = scalar_lea.vmem %s303_s25, 128  ;;  %p428_p6 = scmp.lt.s32.totalorder %s303_s25, %s303_s25 }
  0x17   :  { %349 = vmatprep.subr.bf16.mxu0 %v452_v2  ;;  %p424_p5 = scmp.ne.s32.totalorder %s303_s25, %s423_s26  ;;  %p429_p7 = scmp.lt.s32.totalorder %s423_s26, %s423_s26 }
  0x18   :  { %358 = vmatpush3.bf16.msra.mxu1 %v392_v10 }
  0x19   :  { %359 = vmatprep.subr.bf16.mxu1 %v452_v2  ;;  %p430_p8 = por %p429_p7, %p428_p6 }
  0x1a   :  { %387 = vset.pattern.permute.xlu0 %v451_v1 }
  0x1b   :  { %p431_p9 = pnand %p430_p8, %p424_p5 }
  0x1c   :  { %360 = vmatpush3.bf16.msra.mxu1 %v393_v11 }
  0x1d   :  { %361 = vmatprep.subr.bf16.mxu1 %v452_v2 }
  0x20   :  { %362 = vmatpush3.bf16.msra.mxu1 %v394_v12 }
  0x21   :  { %363 = vmatprep.subr.bf16.mxu1 %v452_v2 }
  0x24   :  { %364 = vmatpush3.bf16.msra.mxu1 %v395_v27 }
  0x25   :  { %365 = vmatprep.subr.bf16.mxu1 %v452_v2 }
  0x28   :  { %366 = vmatpush3.bf16.msra.mxu1 %v396_v28 }
  0x29   :  { %367 = vmatprep.subr.bf16.mxu1 %v452_v2 }
  0x2c   :  { %368 = vmatpush3.bf16.msra.mxu1 %v397_v29 }
  0x2d   :  { %369 = vmatprep.subr.bf16.mxu1 %v452_v2 }
  0x30   :  { %370 = vmatpush3.bf16.msra.mxu1 %v398_v30 }
  0x8c   :  { %v42_v15 = vpop.permute.xlu0 %41  ;;  %v57_v16 = vpop.permute.xlu1 %56 }
  0x8d   :  { %vm43_vm1 = vcmp.eq.s32.totalorder %v39_v14, %v42_v15  ;;  %vm58_vm2 = vcmp.eq.s32.totalorder %v39_v14, %v57_v16 }
  0x8e   :  { %v311_v18 = vsel %vm43_vm1, 1.0, %v452_v2  ;;  %v313_v20 = vsel %vm58_vm2, 1.0, %v452_v2 }
  0x91   :  { %v49_v17 = vpop.permute.xlu0 %48 }
  0x92   :  { %vm50_vm3 = vcmp.eq.s32.totalorder %v39_v14, %v49_v17 }
  0x93   :  { %v312_v19 = vsel %vm50_vm3, 1.0, %v452_v2 }
  0x94   :  { %v53_v21 = vadd.f32 %v312_v19, %v311_v18 }
  0x96   :  { %v61_v22 = vadd.f32 %v313_v20, %v53_v21 }
  0x98   :  { %v62_v24 = vpack.c.bf16 %v61_v22, %v61_v22 }
  0x9a   :  { %346 = vmatmul.mubr.msk.bf16.vlgmr.msra.gmra.mxu0 %vm79_vm4, %v62_v24 }
  0x9b   :  { %350 = vmatpush3.bf16.msra.mxu0 %v390_v23  ;;  %351 = vmatprep.mubr.msk.bf16.mxu0 %vm454_vm0, %v452_v2 }
  0xa2   :  { %352 = vmatmul.mubr.msk.bf16.vlgmr.msra.gmra.mxu0 %vm129_vm5, %v34_v26 }
 0x15a   :  { %v117_v35 = vpop.f32.mrf.mxu0 }
 0x15c   :  { %v347_v36 = vpop.f32.mrf.mxu0 }
 0x15e   :  { %v120_v38 = vpop.f32.mrf.mxu0 }
 0x160   :  { %v348_v39 = vpop.f32.mrf.mxu0 }
 0x162   :  { %v167_v41 = vpop.f32.mrf.mxu0 }
 0x163   :  { %v168_v42 = vadd.f32 %v167_v41, %v117_v35 }
 0x164   :  { %v353_v43 = vpop.f32.mrf.mxu0 }
 0x165   :  { %v178_v44 = vadd.f32 %v177_v40, %v168_v42 }
 0x166   :  { %v170_v45 = vpop.f32.mrf.mxu0 }
 0x167   :  { %v179_v46 = vmax.f32 %v178_v44, 0.0 }
 0x168   :  { %v354_v47 = vpop.f32.mrf.mxu0 }
 0x169   :  { %v180_v48 = vpack.c.bf16 %v179_v46, %v179_v46 }
 0x16b   :  { %372 = vmatmul.mubr.bf16.vlgmr.msra.gmra.mxu1 %v180_v48 }
 0x22b   :  { %v283_v49 = vpop.f32.mrf.mxu1 }
 0x22c   :  { %v284_v50 = vadd.f32 %v283_v49, %v200_v34 }
 0x22d   :  { %v373_v51 = vpop.f32.mrf.mxu1 }
 0x22e   :  { %v289_v52 = vsub.f32 0.0, %v284_v50 }
 0x22f   :  { %v286_v53 = vpop.f32.mrf.mxu1 }
 0x230   :  { %v290_v54 = vmul.f32 1.442695, %v289_v52 }
 0x231   :  { %v374_v55 = vpop.f32.mrf.mxu1 }
 0x232   :  { %399 = vpow2.f32 %v290_v54 }
 0x23f   :  { %v400_v56 = vpop.eup %399 }
 0x240   :  { %v292_v57 = vadd.f32 1.0, %v400_v56 }
 0x242   :  { %401 = vrcp.f32 %v292_v57 }
 0x24f   :  { %v402_v58 = vpop.eup %401 }
 0x250   :  { %295 = vst [vmem:[#allocation5] sm:$0xff] %v402_v58 }
 0x251   :  { %434 = shalt.err (!%p431_p9)
}
 0x252   :  { %305 = dma.vmem_to_hbm [thread:$0]  %s303_s25, 128, %s520_s4, [#allocation4]  }
 0x253   :  { %445 = dma.done.wait [#allocation4], 128  }
 0x254   :  { %446 = vsyncadd [#allocation4], 4294967168 }
 0x255   :  { %309 = vsyncpa [#allocation3], 1 }
 0x256   :  { %310 = vsyncpa [#allocation4], 1 }

</bundles_post_ra>
